<compile_context>
chip_gen: v6e
topology: v6e:2x2x1
jax: 0.10.0
libtpu: 0.0.40
codegen_flags: <defaults>
</compile_context>

<pallas_src>
import math

import jax
import jax.numpy as jnp
from jax.experimental import pallas as pl
from jax.experimental.pallas import tpu as pltpu

_LANES = 128
_MAX_COLS = 4096                        # lane-width cap (keeps rows sublane-tileable)
_BLOCK_BYTES_TARGET = 3 * 1024 * 1024   # ~3 MiB/block -> ~12 MiB with double buffering
_VMEM_LIMIT_BYTES = 32 * 1024 * 1024    # safe scoped-VMEM ceiling on v5e/v6e/v7x
_SINGLE_BLOCK_BYTES_MAX = 4 * 1024 * 1024  # fallback path: whole array as one block


def _copy_kernel(x_ref, o_ref):
    # Pure copy of the current (tile_rows, cols) tile.
    o_ref[...] = x_ref[...]


def _pallas_copy_2d(q2d, tile_rows, total_bytes):
    rows, cols = q2d.shape
    return pl.pallas_call(
        _copy_kernel,
        out_shape=jax.ShapeDtypeStruct((rows, cols), q2d.dtype),
        grid_spec=pl.GridSpec(
            grid=(pl.cdiv(rows, tile_rows),),
            in_specs=[pl.BlockSpec((tile_rows, cols), lambda i: (i, 0))],
            out_specs=pl.BlockSpec((tile_rows, cols), lambda i: (i, 0)),
        ),
        compiler_params=pltpu.CompilerParams(
            dimension_semantics=("parallel",),   # shards grid across v7x's 2 TCs
            vmem_limit_bytes=_VMEM_LIMIT_BYTES,
        ),
        cost_estimate=pl.CostEstimate(
            flops=0,
            transcendentals=0,
            bytes_accessed=2 * total_bytes,
        ),
    )(q2d)


def _materialized_copy(q):
    """Optimized Pallas HBM->HBM copy of q (identity), returned as a new array."""
    total = math.prod(q.shape)
    if total == 0:
        return q
    itemsize = jnp.dtype(q.dtype).itemsize
    total_bytes = total * itemsize

    if total % _LANES == 0:
        # Widen the lane dim as far as divisibility allows (big out_spec lever).
        cols = _LANES
        while cols * 2 <= _MAX_COLS and total % (cols * 2) == 0:
            cols *= 2
        rows = total // cols

        # Largest sublane-aligned row tile that keeps one block <= ~3 MiB.
        budget_rows = max(8, (_BLOCK_BYTES_TARGET // (cols * itemsize)) // 8 * 8)
        tile_rows = rows if rows <= budget_rows else budget_rows
    elif total_bytes <= _SINGLE_BLOCK_BYTES_MAX:
        # Not lane-divisible: copy the whole thing as a single full-extent block
        # (block_shape == full array dims is always legal).
        rows, cols = 1, total
        tile_rows = 1
    else:
        # TODO(synk): tiled remainder handling for large non-128-divisible sizes;
        # aliasing is still exact for IDENTITY, so fall back to it.
        return q

    q2d = q.reshape(rows, cols)
    out2d = _pallas_copy_2d(q2d, tile_rows, total_bytes)
    return out2d.reshape(q.shape)


def identity_fusion(features, materialize=False):
    """Pallas equivalent of IDENTITY.forward.

    Args:
      features: dict with at least 'query_p2' (B, N, C, H, W).  'support_p2'
        and 'support_targets' are accepted but unused, exactly like the
        PyTorch module.
      materialize: if False (default), alias the input — zero HBM traffic,
        which is the optimal implementation of an identity op.  If True, run
        the optimized Pallas copy kernel to produce a fresh buffer.

    Returns:
      A new dict with the same entries plus 'output_features'.
    """
    q = features['query_p2']
    out = _materialized_copy(q) if materialize else q
    new_features = dict(features)
    new_features['output_features'] = out
    return new_features


if __name__ == "__main__":
    key = jax.random.PRNGKey(0)
    k_q, k_s, k_odd = jax.random.split(key, 3)

    # Small shapes consistent with the module's B x N_support x C x H x W.
    B, N, C, H, W = 2, 3, 32, 16, 16
    query_p2 = jax.random.normal(k_q, (B, N, C, H, W), dtype=jnp.float32)
    support_p2 = jax.random.normal(k_s, (N, B, C, H, W), dtype=jnp.float32)

    features = {
        'query_p2': query_p2,
        'support_p2': support_p2,
        'support_targets': None,  # unused by IDENTITY, mirrors the module API
    }

    # Default (fast) path: pure alias, zero HBM traffic.
    aliased = identity_fusion(features)
    assert aliased['output_features'] is query_p2

    # Materialized path: exercises the lane-dense tiled Pallas copy kernel.
    out_features = identity_fusion(features, materialize=True)
    result = jax.block_until_ready(out_features['output_features'])
    assert result.shape == (B, N, C, H, W)
    assert result.dtype == query_p2.dtype
    assert jnp.array_equal(result, query_p2)

    # Also exercise the non-128-divisible fallback (single full-extent block).
    odd = jax.random.normal(k_odd, (3, 5, 7), dtype=jnp.float32)  # 105 elems
    odd_out = jax.block_until_ready(
        identity_fusion({'query_p2': odd,
                         'support_p2': None,
                         'support_targets': None},
                        materialize=True)['output_features'])
    assert odd_out.shape == odd.shape
    assert jnp.array_equal(odd_out, odd)

    print("KERNEL_OK")
</pallas_src>

<mosaic_0001>
module attributes {stable_mosaic.version = 11 : i64} {
  func.func @_copy_kernel(%arg0: i32, %arg1: memref<12x4096xf32, #tpu.memory_space<vmem>>, %arg2: memref<12x4096xf32, #tpu.memory_space<vmem>>) attributes {dimension_semantics = [#tpu.dimension_semantics<parallel>], iteration_bounds = array<i64: 1>, scalar_prefetch = 0 : i64, scratch_operands = 0 : i64, tpu.core_type = #tpu.core_type<tc>, window_params = [{transform_indices = @transform_0, window_bounds = array<i64: 12, 4096>}, {transform_indices = @transform_1, window_bounds = array<i64: 12, 4096>}]} {
    %c0 = arith.constant 0 : index
    %c0_0 = arith.constant 0 : index
    %0 = vector.load %arg1[%c0, %c0_0] : memref<12x4096xf32, #tpu.memory_space<vmem>>, vector<12x4096xf32>
    %c0_1 = arith.constant 0 : index
    %c0_2 = arith.constant 0 : index
    %1 = vector.load %arg2[%c0_1, %c0_2] : memref<12x4096xf32, #tpu.memory_space<vmem>>, vector<12x4096xf32>
    tpu.vector_store %arg2[%c0_1, %c0_2], %0 {strides = array<i32>} : memref<12x4096xf32, #tpu.memory_space<vmem>>, vector<12x4096xf32>,
    return
  }
  func.func @transform_0(%arg0: i32) -> (i32, i32) {
    %c0_i32 = arith.constant 0 : i32
    %c0_i32_0 = arith.constant 0 : i32
    return %arg0, %c0_i32 : i32, i32
  }
  func.func @transform_1(%arg0: i32) -> (i32, i32) {
    %c0_i32 = arith.constant 0 : i32
    %c0_i32_0 = arith.constant 0 : i32
    return %arg0, %c0_i32 : i32, i32
  }
}

</mosaic_0001>

<bundles_post_ra>
// kernel: tpu_custom_call.1
= control target key start
LH: loop header
LB: loop body
LE: loop exit
PB: predicated region body
PF: predicated region fallthrough
CT: control target
= control target key end

     0   :  { %6 = vsyncpa [#allocation3], 0  ;;  %s245_s0 = inlined_call_operand.hbm [shape: f32[12,4096], index: 0, kind: input, shape index: {}]   ;;  %s246_s1 = inlined_call_operand.hbm [shape: f32[12,4096], index: 1, kind: output, shape index: {}]  }
   0x1   :  { %7 = vsyncpa [#allocation4], 0  ;;  %s216_s6 = smov [#allocation2]  }
   0x2   :  { %s13_s7 = sshll.u32 %s216_s6, 4  ;;  %s14_s7 = int_to_ptr.vmem [resolvable:$true] %s13_s7 }
   0x3   :  { %s180_s8 = scalar_lea.vmem %s14_s7, 8192  ;;  %p185_p1 = scmp.lt.s32.totalorder %s14_s7, %s14_s7 }
   0x4   :  { %p181_p0 = scmp.ne.s32.totalorder %s14_s7, %s180_s8  ;;  %p186_p2 = scmp.lt.s32.totalorder %s180_s8, %s180_s8 }
   0x6   :  { %p187_p3 = por %p186_p2, %p185_p1 }
   0x8   :  { %p188_p4 = pnand %p187_p3, %p181_p0 }
   0xa   :  { %191 = shalt.err (!%p188_p4)
}
   0xb   :  { %s217_s9 = smov 4096   ;;  %s218_s10 = smov 256  }
   0xc   :  { %19 = dma.hbm_to_vmem [thread:$0]  %s245_s0, 8192, %s14_s7, [#allocation3], %s217_s9, %s217_s9, %s218_s10  }
   0xd   :  { %212 = dma.done.wait [#allocation3], 8192  }
   0xe   :  { %213 = vsyncadd [#allocation3], 4294959104  ;;  %v23_v0 = vld [vmem:[#allocation2] sm:$0xff]  ;;  %v24_v1 = vld [vmem:[#allocation2 + $0x8] sm:$0xff]  ;;  %s219_s0 = smov [#allocation5]  }
   0xf   :  { %v25_v2 = vld [vmem:[#allocation2 + $0x10] sm:$0xff]  ;;  %87 = vst [vmem:[#allocation5] sm:$0xff] %v23_v0  ;;  %88 = vst [vmem:[#allocation5 + $0x8] sm:$0xff] %v24_v1  ;;  %v26_v3 = vld [vmem:[#allocation2 + $0x18] sm:$0xff]  ;;  %s236_s13 = sshll.u32 %s219_s0, 4  ;;  %s157_s13 = int_to_ptr.vmem [resolvable:$true] %s236_s13 }
  0x10   :  { %89 = vst [vmem:[#allocation5 + $0x10] sm:$0xff] %v25_v2  ;;  %v27_v4 = vld [vmem:[#allocation2 + $0x20] sm:$0xff]  ;;  %v28_v5 = vld [vmem:[#allocation2 + $0x28] sm:$0xff]  ;;  %90 = vst [vmem:[#allocation5 + $0x18] sm:$0xff] %v26_v3  ;;  %s192_s14 = scalar_lea.vmem %s157_s13, 8192  ;;  %p197_p6 = scmp.lt.s32.totalorder %s157_s13, %s157_s13 }
  0x11   :  { %91 = vst [vmem:[#allocation5 + $0x20] sm:$0xff] %v27_v4  ;;  %92 = vst [vmem:[#allocation5 + $0x28] sm:$0xff] %v28_v5  ;;  %v29_v6 = vld [vmem:[#allocation2 + $0x30] sm:$0xff]  ;;  %v30_v7 = vld [vmem:[#allocation2 + $0x38] sm:$0xff]  ;;  %p193_p5 = scmp.ne.s32.totalorder %s157_s13, %s192_s14  ;;  %p198_p7 = scmp.lt.s32.totalorder %s192_s14, %s192_s14 }
  0x12   :  { %v31_v8 = vld [vmem:[#allocation2 + $0x40] sm:$0xff]  ;;  %93 = vst [vmem:[#allocation5 + $0x30] sm:$0xff] %v29_v6  ;;  %94 = vst [vmem:[#allocation5 + $0x38] sm:$0xff] %v30_v7  ;;  %v32_v9 = vld [vmem:[#allocation2 + $0x48] sm:$0xff] }
  0x13   :  { %95 = vst [vmem:[#allocation5 + $0x40] sm:$0xff] %v31_v8  ;;  %v33_v10 = vld [vmem:[#allocation2 + $0x50] sm:$0xff]  ;;  %v34_v11 = vld [vmem:[#allocation2 + $0x58] sm:$0xff]  ;;  %96 = vst [vmem:[#allocation5 + $0x48] sm:$0xff] %v32_v9  ;;  %p199_p8 = por %p198_p7, %p197_p6 }
  0x14   :  { %97 = vst [vmem:[#allocation5 + $0x50] sm:$0xff] %v33_v10  ;;  %98 = vst [vmem:[#allocation5 + $0x58] sm:$0xff] %v34_v11  ;;  %v35_v12 = vld [vmem:[#allocation2 + $0x60] sm:$0xff]  ;;  %v36_v13 = vld [vmem:[#allocation2 + $0x68] sm:$0xff] }
  0x15   :  { %v37_v14 = vld [vmem:[#allocation2 + $0x70] sm:$0xff]  ;;  %99 = vst [vmem:[#allocation5 + $0x60] sm:$0xff] %v35_v12  ;;  %100 = vst [vmem:[#allocation5 + $0x68] sm:$0xff] %v36_v13  ;;  %v38_v15 = vld [vmem:[#allocation2 + $0x78] sm:$0xff]  ;;  %p200_p9 = pnand %p199_p8, %p193_p5 }
  0x16   :  { %101 = vst [vmem:[#allocation5 + $0x70] sm:$0xff] %v37_v14  ;;  %v39_v16 = vld [vmem:[#allocation2 + $0x80] sm:$0xff]  ;;  %v40_v17 = vld [vmem:[#allocation2 + $0x88] sm:$0xff]  ;;  %102 = vst [vmem:[#allocation5 + $0x78] sm:$0xff] %v38_v15 }
  0x17   :  { %103 = vst [vmem:[#allocation5 + $0x80] sm:$0xff] %v39_v16  ;;  %104 = vst [vmem:[#allocation5 + $0x88] sm:$0xff] %v40_v17  ;;  %v41_v18 = vld [vmem:[#allocation2 + $0x90] sm:$0xff]  ;;  %v42_v19 = vld [vmem:[#allocation2 + $0x98] sm:$0xff] }
  0x18   :  { %v43_v20 = vld [vmem:[#allocation2 + $0xa0] sm:$0xff]  ;;  %105 = vst [vmem:[#allocation5 + $0x90] sm:$0xff] %v41_v18  ;;  %106 = vst [vmem:[#allocation5 + $0x98] sm:$0xff] %v42_v19  ;;  %v44_v21 = vld [vmem:[#allocation2 + $0xa8] sm:$0xff] }
  0x19   :  { %107 = vst [vmem:[#allocation5 + $0xa0] sm:$0xff] %v43_v20  ;;  %v45_v22 = vld [vmem:[#allocation2 + $0xb0] sm:$0xff]  ;;  %v46_v23 = vld [vmem:[#allocation2 + $0xb8] sm:$0xff]  ;;  %108 = vst [vmem:[#allocation5 + $0xa8] sm:$0xff] %v44_v21 }
  0x1a   :  { %109 = vst [vmem:[#allocation5 + $0xb0] sm:$0xff] %v45_v22  ;;  %110 = vst [vmem:[#allocation5 + $0xb8] sm:$0xff] %v46_v23  ;;  %v47_v24 = vld [vmem:[#allocation2 + $0xc0] sm:$0xff]  ;;  %v48_v25 = vld [vmem:[#allocation2 + $0xc8] sm:$0xff] }
  0x1b   :  { %v49_v26 = vld [vmem:[#allocation2 + $0xd0] sm:$0xff]  ;;  %111 = vst [vmem:[#allocation5 + $0xc0] sm:$0xff] %v47_v24  ;;  %112 = vst [vmem:[#allocation5 + $0xc8] sm:$0xff] %v48_v25  ;;  %v50_v27 = vld [vmem:[#allocation2 + $0xd8] sm:$0xff] }
  0x1c   :  { %113 = vst [vmem:[#allocation5 + $0xd0] sm:$0xff] %v49_v26  ;;  %v51_v28 = vld [vmem:[#allocation2 + $0xe0] sm:$0xff]  ;;  %v52_v29 = vld [vmem:[#allocation2 + $0xe8] sm:$0xff]  ;;  %114 = vst [vmem:[#allocation5 + $0xd8] sm:$0xff] %v50_v27 }
  0x1d   :  { %115 = vst [vmem:[#allocation5 + $0xe0] sm:$0xff] %v51_v28  ;;  %116 = vst [vmem:[#allocation5 + $0xe8] sm:$0xff] %v52_v29  ;;  %v53_v30 = vld [vmem:[#allocation2 + $0xf0] sm:$0xff]  ;;  %v54_v31 = vld [vmem:[#allocation2 + $0xf8] sm:$0xff] }
  0x1e   :  { %v55_v32 = vld [vmem:[#allocation2 + $0x100] sm:$0xf]  ;;  %117 = vst [vmem:[#allocation5 + $0xf0] sm:$0xff] %v53_v30  ;;  %118 = vst [vmem:[#allocation5 + $0xf8] sm:$0xff] %v54_v31  ;;  %v56_v33 = vld [vmem:[#allocation2 + $0x108] sm:$0xf] }
  0x1f   :  { %119 = vst [vmem:[#allocation5 + $0x100] sm:$0xf] %v55_v32  ;;  %v57_v34 = vld [vmem:[#allocation2 + $0x110] sm:$0xf]  ;;  %v58_v35 = vld [vmem:[#allocation2 + $0x118] sm:$0xf] }
  0x20   :  { %120 = vst [vmem:[#allocation5 + $0x108] sm:$0xf] %v56_v33  ;;  %121 = vst [vmem:[#allocation5 + $0x110] sm:$0xf] %v57_v34  ;;  %v59_v36 = vld [vmem:[#allocation2 + $0x120] sm:$0xf] }
  0x21   :  { %122 = vst [vmem:[#allocation5 + $0x118] sm:$0xf] %v58_v35  ;;  %v60_v37 = vld [vmem:[#allocation2 + $0x128] sm:$0xf]  ;;  %v61_v38 = vld [vmem:[#allocation2 + $0x130] sm:$0xf] }
  0x22   :  { %123 = vst [vmem:[#allocation5 + $0x120] sm:$0xf] %v59_v36  ;;  %124 = vst [vmem:[#allocation5 + $0x128] sm:$0xf] %v60_v37  ;;  %v62_v39 = vld [vmem:[#allocation2 + $0x138] sm:$0xf] }
  0x23   :  { %125 = vst [vmem:[#allocation5 + $0x130] sm:$0xf] %v61_v38  ;;  %v63_v40 = vld [vmem:[#allocation2 + $0x140] sm:$0xf]  ;;  %v64_v41 = vld [vmem:[#allocation2 + $0x148] sm:$0xf] }
  0x24   :  { %126 = vst [vmem:[#allocation5 + $0x138] sm:$0xf] %v62_v39  ;;  %127 = vst [vmem:[#allocation5 + $0x140] sm:$0xf] %v63_v40  ;;  %v65_v42 = vld [vmem:[#allocation2 + $0x150] sm:$0xf] }
  0x25   :  { %128 = vst [vmem:[#allocation5 + $0x148] sm:$0xf] %v64_v41  ;;  %v66_v43 = vld [vmem:[#allocation2 + $0x158] sm:$0xf]  ;;  %v67_v44 = vld [vmem:[#allocation2 + $0x160] sm:$0xf] }
  0x26   :  { %129 = vst [vmem:[#allocation5 + $0x150] sm:$0xf] %v65_v42  ;;  %130 = vst [vmem:[#allocation5 + $0x158] sm:$0xf] %v66_v43  ;;  %v68_v45 = vld [vmem:[#allocation2 + $0x168] sm:$0xf] }
  0x27   :  { %131 = vst [vmem:[#allocation5 + $0x160] sm:$0xf] %v67_v44  ;;  %v69_v46 = vld [vmem:[#allocation2 + $0x170] sm:$0xf]  ;;  %v70_v47 = vld [vmem:[#allocation2 + $0x178] sm:$0xf] }
  0x28   :  { %132 = vst [vmem:[#allocation5 + $0x168] sm:$0xf] %v68_v45  ;;  %133 = vst [vmem:[#allocation5 + $0x170] sm:$0xf] %v69_v46  ;;  %v71_v48 = vld [vmem:[#allocation2 + $0x180] sm:$0xf] }
  0x29   :  { %134 = vst [vmem:[#allocation5 + $0x178] sm:$0xf] %v70_v47  ;;  %v72_v49 = vld [vmem:[#allocation2 + $0x188] sm:$0xf]  ;;  %v73_v50 = vld [vmem:[#allocation2 + $0x190] sm:$0xf] }
  0x2a   :  { %135 = vst [vmem:[#allocation5 + $0x180] sm:$0xf] %v71_v48  ;;  %136 = vst [vmem:[#allocation5 + $0x188] sm:$0xf] %v72_v49  ;;  %v74_v51 = vld [vmem:[#allocation2 + $0x198] sm:$0xf] }
  0x2b   :  { %137 = vst [vmem:[#allocation5 + $0x190] sm:$0xf] %v73_v50  ;;  %v75_v52 = vld [vmem:[#allocation2 + $0x1a0] sm:$0xf]  ;;  %v76_v53 = vld [vmem:[#allocation2 + $0x1a8] sm:$0xf] }
  0x2c   :  { %138 = vst [vmem:[#allocation5 + $0x198] sm:$0xf] %v74_v51  ;;  %139 = vst [vmem:[#allocation5 + $0x1a0] sm:$0xf] %v75_v52  ;;  %v77_v54 = vld [vmem:[#allocation2 + $0x1b0] sm:$0xf] }
  0x2d   :  { %140 = vst [vmem:[#allocation5 + $0x1a8] sm:$0xf] %v76_v53  ;;  %v78_v55 = vld [vmem:[#allocation2 + $0x1b8] sm:$0xf]  ;;  %v79_v56 = vld [vmem:[#allocation2 + $0x1c0] sm:$0xf] }
  0x2e   :  { %141 = vst [vmem:[#allocation5 + $0x1b0] sm:$0xf] %v77_v54  ;;  %142 = vst [vmem:[#allocation5 + $0x1b8] sm:$0xf] %v78_v55  ;;  %v80_v57 = vld [vmem:[#allocation2 + $0x1c8] sm:$0xf] }
  0x2f   :  { %143 = vst [vmem:[#allocation5 + $0x1c0] sm:$0xf] %v79_v56  ;;  %v81_v58 = vld [vmem:[#allocation2 + $0x1d0] sm:$0xf]  ;;  %v82_v59 = vld [vmem:[#allocation2 + $0x1d8] sm:$0xf] }
  0x30   :  { %144 = vst [vmem:[#allocation5 + $0x1c8] sm:$0xf] %v80_v57  ;;  %145 = vst [vmem:[#allocation5 + $0x1d0] sm:$0xf] %v81_v58  ;;  %v83_v60 = vld [vmem:[#allocation2 + $0x1e0] sm:$0xf] }
  0x31   :  { %146 = vst [vmem:[#allocation5 + $0x1d8] sm:$0xf] %v82_v59  ;;  %v84_v61 = vld [vmem:[#allocation2 + $0x1e8] sm:$0xf]  ;;  %v85_v62 = vld [vmem:[#allocation2 + $0x1f0] sm:$0xf] }
  0x32   :  { %147 = vst [vmem:[#allocation5 + $0x1e0] sm:$0xf] %v83_v60  ;;  %148 = vst [vmem:[#allocation5 + $0x1e8] sm:$0xf] %v84_v61  ;;  %v86_v63 = vld [vmem:[#allocation2 + $0x1f8] sm:$0xf] }
  0x33   :  { %149 = vst [vmem:[#allocation5 + $0x1f0] sm:$0xf] %v85_v62  ;;  %150 = vst [vmem:[#allocation5 + $0x1f8] sm:$0xf] %v86_v63 }
  0x34   :  { %203 = shalt.err (!%p200_p9)
}
  0x35   :  { %162 = dma.vmem_to_hbm [thread:$0]  %s157_s13, 8192, %s246_s1, [#allocation4], %s217_s9, %s217_s9, %s218_s10  }
  0x36   :  { %214 = dma.done.wait [#allocation4], 8192  }
  0x37   :  { %215 = vsyncadd [#allocation4], 4294959104 }
  0x38   :  { %166 = vsyncpa [#allocation3], 1 }
  0x39   :  { %167 = vsyncpa [#allocation4], 1 }

</bundles_post_ra>
